<compile_context>
chip_gen: v6e
topology: v6e:2x2x1
jax: 0.10.0
libtpu: 0.0.40
codegen_flags: <defaults>
</compile_context>

<pallas_src>
import numpy as np
import jax
import jax.numpy as jnp
from jax.experimental import pallas as pl
from jax.experimental.pallas import tpu as pltpu


# ----------------------------------------------------------------------------
# MADE mask construction (numpy, deterministic) — mirrors SimpleMADE._create_masks
# ----------------------------------------------------------------------------
def create_made_masks(n_in, hidden_dims, gaussian=False, random_order=False, seed=0):
    np.random.seed(seed)
    L = len(hidden_dims)
    D = n_in
    masks = {}
    masks[0] = np.random.permutation(D) if random_order else np.arange(D)
    for l in range(L):
        low = int(masks[l].min())
        masks[l + 1] = np.random.randint(low=low, high=D - 1, size=hidden_dims[l])
    masks[L + 1] = masks[0]
    mask_matrix = []
    for i in range(len(masks) - 1):
        m = masks[i]
        m_next = masks[i + 1]
        M = (m_next[:, None] >= m[None, :]).astype(np.float32)  # (n_out_layer, n_in_layer)
        mask_matrix.append(M)
    if gaussian:
        last = mask_matrix.pop(-1)
        mask_matrix.append(np.concatenate((last, last), axis=0))
    return mask_matrix  # matches nn.Linear.weight shape per layer


# ----------------------------------------------------------------------------
# One-time parameter preparation (hoisted out of the forward call):
#   fused_ws[i] = (mask_i * W_i).T cast to weight_dtype (bf16), shape (in_i, out_i)
#   bias_rows[i] = b_i as an f32 (1, out_i) row
# ----------------------------------------------------------------------------
def prepare_made_params(weights, biases, mask_matrix, weight_dtype=jnp.bfloat16):
    fused_ws, bias_rows = [], []
    for w, b, m in zip(weights, biases, mask_matrix):
        fw = (jnp.asarray(m, jnp.float32) * jnp.asarray(w, jnp.float32)).T  # (in, out)
        fused_ws.append(fw.astype(weight_dtype))
        bias_rows.append(jnp.asarray(b, jnp.float32).reshape(1, -1))
    # TODO(synk): on v7x consider fp8 weights (bf16 x fp8 MXU path) for further
    # VMEM/DMA savings at realistic MADE widths.
    return fused_ws, bias_rows


# ----------------------------------------------------------------------------
# Pallas kernel factory: fused masked-MLP forward over one batch tile.
#   refs = (x_ref, w1_ref, b1_ref, ..., wN_ref, bN_ref, o_ref)
# Activations stay f32 (VPU/EUP epilogue), cast to bf16 only for the dots.
# ----------------------------------------------------------------------------
def make_made_kernel(n_layers, gaussian=False):
    def kernel(*refs):
        x_ref = refs[0]
        o_ref = refs[-1]
        p_refs = refs[1:-1]  # alternating (weight, bias)

        h = x_ref[...]                                   # (bt, n_in) f32
        for li in range(n_layers):
            w = p_refs[2 * li][...]                      # (in_i, out_i) bf16
            b = p_refs[2 * li + 1][...]                  # (1, out_i)   f32
            h = jnp.dot(h.astype(w.dtype), w,
                        preferred_element_type=jnp.float32) + b
            if li < n_layers - 1:
                h = jnp.maximum(h, 0.0)

        if gaussian:
            o_ref[...] = h.astype(o_ref.dtype)
        else:
            # sigmoid: exp on EUP, approx reciprocal on EUP (free VLIW slot)
            e = jnp.exp(-h)
            o_ref[...] = pl.reciprocal(1.0 + e, approx=True).astype(o_ref.dtype)
    return kernel


# ----------------------------------------------------------------------------
# Wrapper: batch-only grid, no lane padding of x/out, weights VMEM-resident.
# ----------------------------------------------------------------------------
def _round_up(x, m):
    return (x + m - 1) // m * m


def made_forward(x, fused_ws, bias_rows, *, gaussian=False, b_tile=512):
    """x: (B, n_in) f32.  fused_ws[i]: (in_i, out_i) bf16.  bias_rows[i]: (1, out_i) f32."""
    B, n_in = x.shape
    n_layers = len(fused_ws)
    n_out = fused_ws[-1].shape[1]

    # Batch tile: big (mem-bound -> amortize per-step overhead), multiple of 8,
    # clamped so the grid has >= 2 steps (keeps both v7x TensorCores busy).
    bt = min(b_tile, _round_up(pl.cdiv(B, 2), 8))
    bt = max(8, _round_up(bt, 8))
    B_p = _round_up(B, bt)
    grid = (B_p // bt,)

    x_p = x if B_p == B else jnp.pad(x, ((0, B_p - B), (0, 0)))  # rows only

    const_map = lambda i: (0, 0)        # weights/biases stay VMEM-resident
    tile_map = lambda i: (i, 0)

    args = [x_p]
    in_specs = [pl.BlockSpec((bt, n_in), tile_map)]     # last dim == full dim: legal, no padding
    for li in range(n_layers):
        w = fused_ws[li]
        b = bias_rows[li]
        args.append(w)
        in_specs.append(pl.BlockSpec(w.shape, const_map))
        args.append(b)
        in_specs.append(pl.BlockSpec(b.shape, const_map))
        # TODO(synk): on v7x (64 MiB VMEM) pass pipeline_mode=pl.Buffered(1) on
        # these constant-index specs to drop the dead second pipeline buffer.

    out_spec = pl.BlockSpec((bt, n_out), tile_map)      # true n_out; no 128-lane slab

    # Advisory cost estimate so XLA can schedule around the custom call.
    flops = 2 * B_p * sum(w.shape[0] * w.shape[1] for w in fused_ws)
    transcendentals = 0 if gaussian else B_p * n_out
    bytes_accessed = (x_p.size * 4 + B_p * n_out * 4
                      + sum(w.size * w.dtype.itemsize for w in fused_ws)
                      + sum(b.size * 4 for b in bias_rows))
    cost = pl.CostEstimate(flops=int(flops),
                           transcendentals=int(transcendentals),
                           bytes_accessed=int(bytes_accessed))

    # Explicit scoped-VMEM budget (v5e default is 16 MiB; v7x physical is 64 MiB).
    param_bytes = sum(w.size * w.dtype.itemsize for w in fused_ws) \
        + sum(b.size * 4 for b in bias_rows)
    io_bytes = 2 * bt * (n_in + n_out) * 4              # double-buffered x / out tiles
    needed = 2 * param_bytes + io_bytes
    vmem_limit = int(min(max(4 * needed, 32 * 1024 * 1024), 64 * 1024 * 1024))

    out_p = pl.pallas_call(
        make_made_kernel(n_layers, gaussian=gaussian),
        out_shape=jax.ShapeDtypeStruct((B_p, n_out), jnp.float32),
        grid=grid,
        in_specs=in_specs,
        out_specs=out_spec,
        compiler_params=pltpu.CompilerParams(
            dimension_semantics=("parallel",),
            vmem_limit_bytes=vmem_limit),
        cost_estimate=cost,
    )(*args)

    return out_p if B_p == B else out_p[:B]


# ----------------------------------------------------------------------------
# Deterministic parameter init (matches nn.Linear shapes; synthetic values)
# ----------------------------------------------------------------------------
def init_linear(key, n_in, n_out):
    kw, kb = jax.random.split(key)
    bound = 1.0 / np.sqrt(n_in)
    w = jax.random.uniform(kw, (n_out, n_in), jnp.float32, -bound, bound)
    b = jax.random.uniform(kb, (n_out,), jnp.float32, -bound, bound)
    return w, b


def reference_forward(x, weights, biases, mask_matrix, gaussian=False):
    """Pure-JAX f32 reference matching SimpleMADE.forward exactly."""
    h = x
    n = len(weights)
    for i in range(n):
        fw = jnp.asarray(mask_matrix[i], jnp.float32) * weights[i]   # (out, in)
        h = h @ fw.T + biases[i]
        if i < n - 1:
            h = jnp.maximum(h, 0.0)
    return h if gaussian else jax.nn.sigmoid(h)


if __name__ == "__main__":
    # Model config (gaussian=False, random_order=False, seed=0)
    n_in = 8
    hidden_dims = [32, 32]
    gaussian = False
    n_out = 2 * n_in if gaussian else n_in
    B = 256  # b_tile clamps to 128 -> grid of 2 steps (both v7x TCs active)

    # MADE connectivity masks, as in SimpleMADE._create_masks
    mask_matrix = create_made_masks(n_in, hidden_dims, gaussian=gaussian,
                                    random_order=False, seed=0)

    # Deterministic weights / biases (nn.Linear shapes)
    key = jax.random.PRNGKey(0)
    dim_list = [n_in, *hidden_dims, n_out]
    weights, biases = [], []
    for i in range(len(dim_list) - 1):
        key, sub = jax.random.split(key)
        w, b = init_linear(sub, dim_list[i], dim_list[i + 1])   # w: (out, in)
        weights.append(w)
        biases.append(b)

    # Mask fusion + bf16 cast hoisted out of the forward (done ONCE here).
    fused_ws, bias_rows = prepare_made_params(weights, biases, mask_matrix,
                                              weight_dtype=jnp.bfloat16)

    # Input
    key, kx = jax.random.split(key)
    x = jax.random.normal(kx, (B, n_in), jnp.float32)

    fwd = jax.jit(made_forward, static_argnames=("gaussian", "b_tile"))
    out = fwd(x, fused_ws, bias_rows, gaussian=gaussian, b_tile=512)
    out = jax.block_until_ready(out)

    ref = reference_forward(x, weights, biases, mask_matrix, gaussian=gaussian)
    # bf16 weights/dot-operands + approx reciprocal -> loosened tolerance.
    np.testing.assert_allclose(np.asarray(out), np.asarray(ref),
                               rtol=2e-2, atol=2e-2)

    print("KERNEL_OK")
</pallas_src>

<mosaic_0001>
module attributes {stable_mosaic.version = 11 : i64} {
  func.func @kernel(%arg0: i32, %arg1: memref<128x8xf32, #tpu.memory_space<vmem>>, %arg2: memref<8x32xbf16, #tpu.memory_space<vmem>>, %arg3: memref<1x32xf32, #tpu.memory_space<vmem>>, %arg4: memref<32x32xbf16, #tpu.memory_space<vmem>>, %arg5: memref<1x32xf32, #tpu.memory_space<vmem>>, %arg6: memref<32x8xbf16, #tpu.memory_space<vmem>>, %arg7: memref<1x8xf32, #tpu.memory_space<vmem>>, %arg8: memref<128x8xf32, #tpu.memory_space<vmem>>) attributes {dimension_semantics = [#tpu.dimension_semantics<parallel>], iteration_bounds = array<i64: 2>, scalar_prefetch = 0 : i64, scratch_operands = 0 : i64, tpu.core_type = #tpu.core_type<tc>, window_params = [{transform_indices = @transform_0, window_bounds = array<i64: 128, 8>}, {pipeline_mode = #tpu.pipeline_mode<synchronous>, transform_indices = @transform_1, window_bounds = array<i64: 8, 32>}, {pipeline_mode = #tpu.pipeline_mode<synchronous>, transform_indices = @transform_2, window_bounds = array<i64: 1, 32>}, {pipeline_mode = #tpu.pipeline_mode<synchronous>, transform_indices = @transform_3, window_bounds = array<i64: 32, 32>}, {pipeline_mode = #tpu.pipeline_mode<synchronous>, transform_indices = @transform_4, window_bounds = array<i64: 1, 32>}, {pipeline_mode = #tpu.pipeline_mode<synchronous>, transform_indices = @transform_5, window_bounds = array<i64: 32, 8>}, {pipeline_mode = #tpu.pipeline_mode<synchronous>, transform_indices = @transform_6, window_bounds = array<i64: 1, 8>}, {transform_indices = @transform_7, window_bounds = array<i64: 128, 8>}]} {
    %c0 = arith.constant 0 : index
    %c0_0 = arith.constant 0 : index
    %0 = vector.load %arg1[%c0, %c0_0] : memref<128x8xf32, #tpu.memory_space<vmem>>, vector<128x8xf32>
    %c0_1 = arith.constant 0 : index
    %c0_2 = arith.constant 0 : index
    %1 = vector.load %arg2[%c0_1, %c0_2] : memref<8x32xbf16, #tpu.memory_space<vmem>>, vector<8x32xbf16>
    %c0_3 = arith.constant 0 : index
    %c0_4 = arith.constant 0 : index
    %2 = vector.load %arg3[%c0_3, %c0_4] : memref<1x32xf32, #tpu.memory_space<vmem>>, vector<1x32xf32>
    %3 = arith.truncf %0 : vector<128x8xf32> to vector<128x8xbf16>
    %cst = arith.constant dense<0.000000e+00> : vector<128x32xf32>
    %4 = tpu.matmul %3, %1, %cst {dimension_numbers = #tpu.dot_dimension_numbers<[1], [0], [0], [1], [0, 0, 1, 1], [], []>} : vector<128x8xbf16>, vector<8x32xbf16>, vector<128x32xf32> -> vector<128x32xf32>
    %5 = vector.broadcast %2 : vector<1x32xf32> to vector<128x32xf32>
    %6 = arith.addf %4, %5 : vector<128x32xf32>
    %cst_5 = arith.constant 0.000000e+00 : f32
    %7 = vector.broadcast %cst_5 : f32 to vector<128x32xf32>
    %8 = arith.maximumf %6, %7 : vector<128x32xf32>
    %c0_6 = arith.constant 0 : index
    %c0_7 = arith.constant 0 : index
    %9 = vector.load %arg4[%c0_6, %c0_7] : memref<32x32xbf16, #tpu.memory_space<vmem>>, vector<32x32xbf16>
    %c0_8 = arith.constant 0 : index
    %c0_9 = arith.constant 0 : index
    %10 = vector.load %arg5[%c0_8, %c0_9] : memref<1x32xf32, #tpu.memory_space<vmem>>, vector<1x32xf32>
    %11 = arith.truncf %8 : vector<128x32xf32> to vector<128x32xbf16>
    %cst_10 = arith.constant dense<0.000000e+00> : vector<128x32xf32>
    %12 = tpu.matmul %11, %9, %cst_10 {dimension_numbers = #tpu.dot_dimension_numbers<[1], [0], [0], [1], [0, 0, 1, 1], [], []>} : vector<128x32xbf16>, vector<32x32xbf16>, vector<128x32xf32> -> vector<128x32xf32>
    %13 = vector.broadcast %10 : vector<1x32xf32> to vector<128x32xf32>
    %14 = arith.addf %12, %13 : vector<128x32xf32>
    %cst_11 = arith.constant 0.000000e+00 : f32
    %15 = vector.broadcast %cst_11 : f32 to vector<128x32xf32>
    %16 = arith.maximumf %14, %15 : vector<128x32xf32>
    %c0_12 = arith.constant 0 : index
    %c0_13 = arith.constant 0 : index
    %17 = vector.load %arg6[%c0_12, %c0_13] : memref<32x8xbf16, #tpu.memory_space<vmem>>, vector<32x8xbf16>
    %c0_14 = arith.constant 0 : index
    %c0_15 = arith.constant 0 : index
    %18 = vector.load %arg7[%c0_14, %c0_15] : memref<1x8xf32, #tpu.memory_space<vmem>>, vector<1x8xf32>
    %19 = arith.truncf %16 : vector<128x32xf32> to vector<128x32xbf16>
    %cst_16 = arith.constant dense<0.000000e+00> : vector<128x8xf32>
    %20 = tpu.matmul %19, %17, %cst_16 {dimension_numbers = #tpu.dot_dimension_numbers<[1], [0], [0], [1], [0, 0, 1, 1], [], []>} : vector<128x32xbf16>, vector<32x8xbf16>, vector<128x8xf32> -> vector<128x8xf32>
    %21 = vector.broadcast %18 : vector<1x8xf32> to vector<128x8xf32>
    %22 = arith.addf %20, %21 : vector<128x8xf32>
    %cst_17 = arith.constant 0.000000e+00 : f32
    %23 = vector.broadcast %cst_17 : f32 to vector<128x8xf32>
    %24 = arith.subf %23, %22 : vector<128x8xf32>
    %25 = math.exp %24 : vector<128x8xf32>
    %cst_18 = arith.constant 1.000000e+00 : f32
    %26 = vector.broadcast %cst_18 : f32 to vector<128x8xf32>
    %27 = arith.addf %26, %25 : vector<128x8xf32>
    %28 = tpu.reciprocal %27 {approx = true} : vector<128x8xf32> -> vector<128x8xf32>
    %c0_19 = arith.constant 0 : index
    %c0_20 = arith.constant 0 : index
    %29 = vector.load %arg8[%c0_19, %c0_20] : memref<128x8xf32, #tpu.memory_space<vmem>>, vector<128x8xf32>
    tpu.vector_store %arg8[%c0_19, %c0_20], %28 {strides = array<i32>} : memref<128x8xf32, #tpu.memory_space<vmem>>, vector<128x8xf32>,
    return
  }
  func.func @transform_0(%arg0: i32) -> (i32, i32) {
    %c0_i32 = arith.constant 0 : i32
    %c0_i32_0 = arith.constant 0 : i32
    return %arg0, %c0_i32 : i32, i32
  }
  func.func @transform_1(%arg0: i32) -> (i32, i32) {
    %c0_i32 = arith.constant 0 : i32
    %c0_i32_0 = arith.constant 0 : i32
    %c0_i32_1 = arith.constant 0 : i32
    return %c0_i32, %c0_i32_0 : i32, i32
  }
  func.func @transform_2(%arg0: i32) -> (i32, i32) {
    %c0_i32 = arith.constant 0 : i32
    %c0_i32_0 = arith.constant 0 : i32
    %c0_i32_1 = arith.constant 0 : i32
    return %c0_i32, %c0_i32_0 : i32, i32
  }
  func.func @transform_3(%arg0: i32) -> (i32, i32) {
    %c0_i32 = arith.constant 0 : i32
    %c0_i32_0 = arith.constant 0 : i32
    %c0_i32_1 = arith.constant 0 : i32
    return %c0_i32, %c0_i32_0 : i32, i32
  }
  func.func @transform_4(%arg0: i32) -> (i32, i32) {
    %c0_i32 = arith.constant 0 : i32
    %c0_i32_0 = arith.constant 0 : i32
    %c0_i32_1 = arith.constant 0 : i32
    return %c0_i32, %c0_i32_0 : i32, i32
  }
  func.func @transform_5(%arg0: i32) -> (i32, i32) {
    %c0_i32 = arith.constant 0 : i32
    %c0_i32_0 = arith.constant 0 : i32
    %c0_i32_1 = arith.constant 0 : i32
    return %c0_i32, %c0_i32_0 : i32, i32
  }
  func.func @transform_6(%arg0: i32) -> (i32, i32) {
    %c0_i32 = arith.constant 0 : i32
    %c0_i32_0 = arith.constant 0 : i32
    %c0_i32_1 = arith.constant 0 : i32
    return %c0_i32, %c0_i32_0 : i32, i32
  }
  func.func @transform_7(%arg0: i32) -> (i32, i32) {
    %c0_i32 = arith.constant 0 : i32
    %c0_i32_0 = arith.constant 0 : i32
    return %arg0, %c0_i32 : i32, i32
  }
}

</mosaic_0001>

<bundles_post_ra>
// kernel: made_forward.1
= control target key start
LH: loop header
LB: loop body
LE: loop exit
PB: predicated region body
PF: predicated region fallthrough
CT: control target
= control target key end

     0   :  { %s1187_s24 = smov 0   ;;  %s1311_s0 = inlined_call_operand.vmem [shape: f32[256,8], index: 0, kind: input, shape index: {}]   ;;  %s1312_s1 = inlined_call_operand.vmem [shape: bf16[8,32], index: 1, kind: input, shape index: {}]   ;;  %s1313_s2 = inlined_call_operand.vmem [shape: f32[1,32], index: 2, kind: input, shape index: {}]   ;;  %s1314_s3 = inlined_call_operand.vmem [shape: bf16[32,32], index: 3, kind: input, shape index: {}]   ;;  %s1315_s4 = inlined_call_operand.vmem [shape: f32[1,32], index: 4, kind: input, shape index: {}]   ;;  %s1316_s5 = inlined_call_operand.vmem [shape: bf16[32,8], index: 5, kind: input, shape index: {}]   ;;  %s1317_s6 = inlined_call_operand.vmem [shape: f32[1,8], index: 6, kind: input, shape index: {}]   ;;  %s1318_s7 = inlined_call_operand.vmem [shape: f32[256,8], index: 7, kind: output, shape index: {}]  }
   0x1 LB: > { %s930_s25 = sadd.s32 4294967295, %s1145_s24   ;;  %p934_p0 = scmp.ge.s32.totalorder %s1145_s24, 1  ;;  %s1145_s24 = sphi %s1187_s24, %s17_s24  }
   0x2   : > { %p238_p1 = scmp.lt.s32.totalorder %s1145_s24, 3 }
   0x4   : > { %p239_p2 = pnand %p934_p0, %p238_p1 }
   0x5   : > { %s935_s28 = sshll.u32 (!%p239_p2), %s930_s25, 4 }
   0x6   : > { %242 = sbr.rel (%p239_p2) target bundleno = 691 (0x2b3), region = 48  ;;  %p271_p3 = scmp.lt.s32.totalorder (!%p239_p2), %s935_s28, 31 }
   0xb   : > { %v299_v0 = vld [vmem:[%s1312_s1] sm:$0xf]  ;;  %vm340_vm0 = vcmask 1043456   ;;  %v1071_v1 = vld [vmem:[%s1314_s3 + $0x8] sm:$0xff]   ;;  %s1320_s28 = smov (!%p271_p3, %s935_s28), 31  ;;  %vm315_vm1 = vcmask 64512  }
   0xc   : > { %1061 = vmatprep.subr.msk.bf16.mxu0 %vm340_vm0, %v299_v0  ;;  %v342_v2 = vsel %vm340_vm0, %v299_v0, 0  ;;  %1062 = vmatprep.subr.msk.bf16.mxu1 %vm340_vm0, %v299_v0  ;;  %s936_s8 = sshll.u32 %s1320_s28, 3  ;;  %v1072_v27 = vld [vmem:[%s1314_s3] sm:$0xff]   ;;  %v1073_v28 = vld [vmem:[%s1316_s5 + $0x8] sm:$0xff]   ;;  %vm488_vm2 = vcmask 261120  }
   0xd   : > { %1002 = vmatpush3.bf16.msra.mxu0 %v342_v2  ;;  %1060 = vmatpush3.bf16.msra.mxu1 %v342_v2  ;;  %s274_s11 = scalar_lea.vmem %s1311_s0, %s936_s8  ;;  %v939_v31 = vld [vmem:[%s1313_s2] ss:$0 sm:$0xff]  ;;  %s1274_s27 = scalar_lea.vmem %s1318_s7, %s936_s8 }
   0xe   : > { %1019 = vmatprep.subr.bf16.mxu1 %v1071_v1  ;;  %v283_v3 = vld [vmem:[%s274_s11] sm:$0xff]  ;;  %v284_v4 = vld [vmem:[%s274_s11 + $0x8] sm:$0xff]  ;;  %v285_v5 = vld [vmem:[%s274_s11 + $0x10] sm:$0xff]  ;;  %1039 = vmatprep.subr.bf16.mxu0 %v1073_v28 }
   0xf   : > { %v301_v6 = vpack.c.bf16 %v284_v4, %v283_v3  ;;  %v286_v7 = vld [vmem:[%s274_s11 + $0x18] sm:$0xff]  ;;  %v287_v8 = vld [vmem:[%s274_s11 + $0x20] sm:$0xff]  ;;  %v288_v9 = vld [vmem:[%s274_s11 + $0x28] sm:$0xff] }
  0x10   : > { %v302_v10 = vpack.c.bf16 %v286_v7, %v285_v5  ;;  %v303_v11 = vpack.c.bf16 %v288_v9, %v287_v8  ;;  %v291_v12 = vld [vmem:[%s274_s11 + $0x40] sm:$0xff]  ;;  %v292_v13 = vld [vmem:[%s274_s11 + $0x48] sm:$0xff]  ;;  %v293_v14 = vld [vmem:[%s274_s11 + $0x50] sm:$0xff] }
  0x11   : > { %1003 = vmatprep.mubr.msk.bf16.mxu0 %vm315_vm1, %v301_v6  ;;  %v294_v15 = vld [vmem:[%s274_s11 + $0x58] sm:$0xff]  ;;  %v305_v16 = vpack.c.bf16 %v292_v13, %v291_v12  ;;  %v295_v18 = vld [vmem:[%s274_s11 + $0x60] sm:$0xff]  ;;  %v296_v19 = vld [vmem:[%s274_s11 + $0x68] sm:$0xff] }
  0x12   : > { %1004 = vmatmul.mubr.msk.bf16.vlgmr.msra.gmra.mxu0 %vm315_vm1, %v302_v10  ;;  %v306_v17 = vpack.c.bf16 %v294_v15, %v293_v14  ;;  %v289_v20 = vld [vmem:[%s274_s11 + $0x30] sm:$0xff]  ;;  %v290_v21 = vld [vmem:[%s274_s11 + $0x38] sm:$0xff]  ;;  %v307_v22 = vpack.c.bf16 %v296_v19, %v295_v18 }
  0x13   : > { %1007 = vmatprep.mubr.msk.bf16.mxu0 %vm315_vm1, %v303_v11  ;;  %1011 = vmatprep.mubr.msk.bf16.mxu1 %vm315_vm1, %v305_v16  ;;  %v304_v23 = vpack.c.bf16 %v290_v21, %v289_v20  ;;  %v297_v24 = vld [vmem:[%s274_s11 + $0x70] sm:$0xff]  ;;  %v298_v25 = vld [vmem:[%s274_s11 + $0x78] sm:$0xff] }
  0x14   : > { %1012 = vmatmul.mubr.msk.bf16.vlgmr.msra.gmra.mxu1 %vm315_vm1, %v306_v17  ;;  %v308_v26 = vpack.c.bf16 %v298_v25, %v297_v24  ;;  %1040 = vmatpush3.bf16.msra.mxu0 %v1073_v28  ;;  %v948_v25 = vld [vmem:[%s1315_s4] ss:$0 sm:$0xff] }
  0x15   : > { %1015 = vmatprep.mubr.msk.bf16.mxu1 %vm315_vm1, %v307_v22  ;;  %1020 = vmatpush3.bf16.msra.mxu1 %v1071_v1  ;;  %v1074_v22 = vld [vmem:[%s1316_s5] sm:$0xff]  }
  0x16   : > { %1021 = vmatprep.subr.bf16.mxu1 %v1072_v27  ;;  %1041 = vmatprep.subr.bf16.mxu0 %v1074_v22 }
  0x18   : > { %1042 = vmatpush3.bf16.msra.mxu0 %v1074_v22 }
  0x19   : > { %1022 = vmatpush3.bf16.msra.mxu1 %v1072_v27 }
  0x1a   : > { %1008 = vmatmul.mubr.msk.bf16.gmra.mxu0 %vm315_vm1, %v304_v23 }
  0x1c   : > { %1016 = vmatmul.mubr.msk.bf16.gmra.mxu1 %vm315_vm1, %v308_v26 }
  0xd2   : > { %v1005_v29 = vpop.f32.mrf.mxu0 }
  0xd3   : > { %v387_v37 = vadd.f32 %v1005_v29, %v939_v31 }
  0xd4   : > { %v378_v30 = vpop.f32.mrf.mxu0  ;;  %v1013_v32 = vpop.f32.mrf.mxu1 }
  0xd5   : > { %v379_v34 = vadd.f32 %v939_v31, %v378_v30  ;;  %v443_v46 = vmax.f32 %v387_v37, 0.0  ;;  %v419_v8 = vadd.f32 %v1013_v32, %v939_v31 }
  0xd6   : > { %v1006_v33 = vpop.f32.mrf.mxu0  ;;  %v410_v36 = vpop.f32.mrf.mxu1 }
  0xd7   : > { %v390_v35 = vadd.f32 %v1006_v33, %v939_v31  ;;  %v441_v43 = vmax.f32 %v379_v34, 0.0  ;;  %v411_v49 = vadd.f32 %v939_v31, %v410_v36  ;;  %v451_v13 = vmax.f32 %v419_v8, 0.0 }
  0xd8   : > { %v381_v38 = vpop.f32.mrf.mxu0  ;;  %v1014_v40 = vpop.f32.mrf.mxu1 }
  0xd9   : > { %v382_v39 = vadd.f32 %v939_v31, %v381_v38  ;;  %v444_v41 = vmax.f32 %v390_v35, 0.0  ;;  %v449_v59 = vmax.f32 %v411_v49, 0.0  ;;  %v422_v10 = vadd.f32 %v1014_v40, %v939_v31 }
  0xda   : > { %v1009_v42 = vpop.f32.mrf.mxu0  ;;  %v413_v45 = vpop.f32.mrf.mxu1 }
  0xdb   : > { %v442_v44 = vmax.f32 %v382_v39, 0.0  ;;  %v414_v50 = vadd.f32 %v939_v31, %v413_v45  ;;  %v463_v52 = vpack.c.bf16 %v444_v41, %v443_v46  ;;  %v403_v57 = vadd.f32 %v1009_v42, %v939_v31 }
  0xdc   : > { %v394_v47 = vpop.f32.mrf.mxu0  ;;  %v1017_v51 = vpop.f32.mrf.mxu1  ;;  %v452_v14 = vmax.f32 %v422_v10, 0.0 }
  0xdd   : > { %v462_v48 = vpack.c.bf16 %v442_v44, %v441_v43  ;;  %v395_v54 = vadd.f32 %v939_v31, %v394_v47  ;;  %v450_v61 = vmax.f32 %v414_v50, 0.0  ;;  %v447_v3 = vmax.f32 %v403_v57, 0.0 }
  0xde   : > { %v1010_v53 = vpop.f32.mrf.mxu0  ;;  %v426_v56 = vpop.f32.mrf.mxu1  ;;  %v467_v16 = vpack.c.bf16 %v452_v14, %v451_v13  ;;  %v435_v17 = vadd.f32 %v1017_v51, %v939_v31 }
  0xdf   : > { %v406_v55 = vadd.f32 %v1010_v53, %v939_v31  ;;  %1023 = vmatprep.mubr.msk.bf16.mxu1 %vm488_vm2, %v462_v48  ;;  %v445_v0 = vmax.f32 %v395_v54, 0.0  ;;  %v466_v5 = vpack.c.bf16 %v450_v61, %v449_v59  ;;  %v427_v6 = vadd.f32 %v939_v31, %v426_v56 }
  0xe0   : > { %v397_v58 = vpop.f32.mrf.mxu0  ;;  %1024 = vmatmul.mubr.msk.bf16.vlgmr.msra.gmra.mxu1 %vm488_vm2, %v463_v52  ;;  %v1018_v62 = vpop.f32.mrf.mxu1  ;;  %v455_v19 = vmax.f32 %v435_v17, 0.0 }
  0xe1   : > { %v398_v60 = vadd.f32 %v939_v31, %v397_v58  ;;  %v448_v63 = vmax.f32 %v406_v55, 0.0  ;;  %v453_v11 = vmax.f32 %v427_v6, 0.0  ;;  %v438_v18 = vadd.f32 %v1018_v62, %v939_v31 }
  0xe2   : > { %v429_v2 = vpop.f32.mrf.mxu1 }
  0xe3   : > { %v446_v1 = vmax.f32 %v398_v60, 0.0  ;;  %v430_v7 = vadd.f32 %v939_v31, %v429_v2  ;;  %v465_v9 = vpack.c.bf16 %v448_v63, %v447_v3  ;;  %v456_v20 = vmax.f32 %v438_v18, 0.0 }
  0xe5   : > { %v464_v4 = vpack.c.bf16 %v446_v1, %v445_v0  ;;  %v454_v12 = vmax.f32 %v430_v7, 0.0  ;;  %v469_v21 = vpack.c.bf16 %v456_v20, %v455_v19 }
  0xe7   : > { %1027 = vmatprep.mubr.msk.bf16.mxu1 %vm488_vm2, %v464_v4  ;;  %v468_v15 = vpack.c.bf16 %v454_v12, %v453_v11 }
  0xe8   : > { %1028 = vmatmul.mubr.msk.bf16.gmra.mxu1 %vm488_vm2, %v465_v9 }
  0xe9   : > { %1031 = vmatprep.mubr.msk.bf16.mxu1 %vm488_vm2, %v466_v5 }
  0xf0   : > { %1032 = vmatmul.mubr.msk.bf16.gmra.mxu1 %vm488_vm2, %v467_v16  ;;  %v1251_v16 = vld [vmem:[%s1317_s6] ss:$0 sm:$0xff] }
  0xf1   : > { %1035 = vmatprep.mubr.msk.bf16.mxu1 %vm488_vm2, %v468_v15 }
  0xf8   : > { %1036 = vmatmul.mubr.msk.bf16.gmra.mxu1 %vm488_vm2, %v469_v21 }
 0x1a0   : > { %v1025_v23 = vpop.f32.mrf.mxu1 }
 0x1a1   : > { %v556_v29 = vadd.f32 %v1025_v23, %v948_v25 }
 0x1a2   : > { %v547_v24 = vpop.f32.mrf.mxu1 }
 0x1a3   : > { %v548_v27 = vadd.f32 %v948_v25, %v547_v24  ;;  %v612_v36 = vmax.f32 %v556_v29, 0.0 }
 0x1a4   : > { %v1026_v26 = vpop.f32.mrf.mxu1 }
 0x1a5   : > { %v559_v28 = vadd.f32 %v1026_v26, %v948_v25  ;;  %v610_v34 = vmax.f32 %v548_v27, 0.0 }
 0x1a6   : > { %v550_v30 = vpop.f32.mrf.mxu1 }
 0x1a7   : > { %v551_v31 = vadd.f32 %v948_v25, %v550_v30  ;;  %v613_v32 = vmax.f32 %v559_v28, 0.0 }
 0x1a8   : > { %v1029_v33 = vpop.f32.mrf.mxu1 }
 0x1a9   : > { %v611_v35 = vmax.f32 %v551_v31, 0.0  ;;  %v632_v39 = vpack.c.bf16 %v613_v32, %v612_v36  ;;  %v572_v43 = vadd.f32 %v1029_v33, %v948_v25 }
 0x1aa   : > { %v563_v37 = vpop.f32.mrf.mxu1 }
 0x1ab   : > { %v631_v38 = vpack.c.bf16 %v611_v35, %v610_v34  ;;  %v564_v41 = vadd.f32 %v948_v25, %v563_v37  ;;  %v616_v50 = vmax.f32 %v572_v43, 0.0 }
 0x1ac   : > { %v1030_v40 = vpop.f32.mrf.mxu1 }
 0x1ad   : > { %v575_v42 = vadd.f32 %v1030_v40, %v948_v25  ;;  %1043 = vmatprep.mubr.msk.bf16.mxu0 %vm488_vm2, %v631_v38  ;;  %v614_v48 = vmax.f32 %v564_v41, 0.0 }
 0x1ae   : > { %v566_v44 = vpop.f32.mrf.mxu1  ;;  %1044 = vmatmul.mubr.msk.bf16.vlgmr.msra.gmra.mxu0 %vm488_vm2, %v632_v39 }
 0x1af   : > { %v567_v45 = vadd.f32 %v948_v25, %v566_v44  ;;  %v617_v46 = vmax.f32 %v575_v42, 0.0 }
 0x1b0   : > { %v1033_v47 = vpop.f32.mrf.mxu1 }
 0x1b1   : > { %v615_v49 = vmax.f32 %v567_v45, 0.0  ;;  %v634_v53 = vpack.c.bf16 %v617_v46, %v616_v50  ;;  %v588_v57 = vadd.f32 %v1033_v47, %v948_v25 }
 0x1b2   : > { %v579_v51 = vpop.f32.mrf.mxu1 }
 0x1b3   : > { %v633_v52 = vpack.c.bf16 %v615_v49, %v614_v48  ;;  %v580_v55 = vadd.f32 %v948_v25, %v579_v51  ;;  %v620_v0 = vmax.f32 %v588_v57, 0.0 }
 0x1b4   : > { %v1034_v54 = vpop.f32.mrf.mxu1 }
 0x1b5   : > { %v591_v56 = vadd.f32 %v1034_v54, %v948_v25  ;;  %1047 = vmatprep.mubr.msk.bf16.mxu0 %vm488_vm2, %v633_v52  ;;  %v618_v62 = vmax.f32 %v580_v55, 0.0 }
 0x1b6   : > { %v582_v58 = vpop.f32.mrf.mxu1  ;;  %1048 = vmatmul.mubr.msk.bf16.gmra.mxu0 %vm488_vm2, %v634_v53 }
 0x1b7   : > { %v583_v59 = vadd.f32 %v948_v25, %v582_v58  ;;  %v621_v60 = vmax.f32 %v591_v56, 0.0 }
 0x1b8   : > { %v1037_v61 = vpop.f32.mrf.mxu1 }
 0x1b9   : > { %v619_v63 = vmax.f32 %v583_v59, 0.0  ;;  %v636_v3 = vpack.c.bf16 %v621_v60, %v620_v0  ;;  %v604_v7 = vadd.f32 %v1037_v61, %v948_v25 }
 0x1ba   : > { %v595_v1 = vpop.f32.mrf.mxu1 }
 0x1bb   : > { %v635_v2 = vpack.c.bf16 %v619_v63, %v618_v62  ;;  %v596_v5 = vadd.f32 %v948_v25, %v595_v1  ;;  %v624_v13 = vmax.f32 %v604_v7, 0.0 }
 0x1bc   : > { %v1038_v4 = vpop.f32.mrf.mxu1 }
 0x1bd   : > { %v607_v6 = vadd.f32 %v1038_v4, %v948_v25  ;;  %1051 = vmatprep.mubr.msk.bf16.mxu0 %vm488_vm2, %v635_v2  ;;  %v622_v11 = vmax.f32 %v596_v5, 0.0 }
 0x1be   : > { %v598_v8 = vpop.f32.mrf.mxu1  ;;  %1052 = vmatmul.mubr.msk.bf16.gmra.mxu0 %vm488_vm2, %v636_v3 }
 0x1bf   : > { %v599_v9 = vadd.f32 %v948_v25, %v598_v8  ;;  %v625_v10 = vmax.f32 %v607_v6, 0.0 }
 0x1c1   : > { %v623_v12 = vmax.f32 %v599_v9, 0.0  ;;  %v638_v15 = vpack.c.bf16 %v625_v10, %v624_v13 }
 0x1c3   : > { %v637_v14 = vpack.c.bf16 %v623_v12, %v622_v11 }
 0x1c5   : > { %1055 = vmatprep.mubr.msk.bf16.mxu0 %vm488_vm2, %v637_v14 }
 0x1c6   : > { %1056 = vmatmul.mubr.msk.bf16.gmra.mxu0 %vm488_vm2, %v638_v15 }
 0x26e   : > { %v1045_v17 = vpop.f32.mrf.mxu0 }
 0x26f   : > { %v724_v18 = vadd.f32 %v1045_v17, %v1251_v16 }
 0x270   : > { %v715_v19 = vpop.f32.mrf.mxu0 }
 0x271   : > { %v780_v20 = vsub.f32 0.0, %v724_v18  ;;  %v716_v21 = vadd.f32 %v1251_v16, %v715_v19 }
 0x272   : > { %v1046_v22 = vpop.f32.mrf.mxu0 }
 0x273   : > { %v798_v23 = vmul.f32 1.442695, %v780_v20  ;;  %v778_v24 = vsub.f32 0.0, %v716_v21  ;;  %v727_v25 = vadd.f32 %v1046_v22, %v1251_v16 }
 0x274   : > { %v718_v26 = vpop.f32.mrf.mxu0 }
 0x275   : > { %1075 = vpow2.f32 %v798_v23  ;;  %v794_v27 = vmul.f32 1.442695, %v778_v24  ;;  %v781_v28 = vsub.f32 0.0, %v727_v25  ;;  %v719_v29 = vadd.f32 %v1251_v16, %v718_v26 }
 0x276   : > { %v1049_v30 = vpop.f32.mrf.mxu0 }
 0x277   : > { %1077 = vpow2.f32 %v794_v27  ;;  %v800_v31 = vmul.f32 1.442695, %v781_v28  ;;  %v779_v32 = vsub.f32 0.0, %v719_v29  ;;  %v740_v33 = vadd.f32 %v1049_v30, %v1251_v16 }
 0x278   : > { %v731_v34 = vpop.f32.mrf.mxu0 }
 0x279   : > { %1079 = vpow2.f32 %v800_v31  ;;  %v796_v35 = vmul.f32 1.442695, %v779_v32  ;;  %v784_v36 = vsub.f32 0.0, %v740_v33  ;;  %v732_v37 = vadd.f32 %v1251_v16, %v731_v34 }
 0x27a   : > { %v1050_v38 = vpop.f32.mrf.mxu0 }
 0x27b   : > { %1081 = vpow2.f32 %v796_v35  ;;  %v806_v39 = vmul.f32 1.442695, %v784_v36  ;;  %v782_v40 = vsub.f32 0.0, %v732_v37  ;;  %v743_v41 = vadd.f32 %v1050_v38, %v1251_v16 }
 0x27c   : > { %v734_v42 = vpop.f32.mrf.mxu0 }
 0x27d   : > { %1083 = vpow2.f32 %v806_v39  ;;  %v802_v43 = vmul.f32 1.442695, %v782_v40  ;;  %v785_v44 = vsub.f32 0.0, %v743_v41  ;;  %v735_v45 = vadd.f32 %v1251_v16, %v734_v42 }
 0x27e   : > { %v1053_v46 = vpop.f32.mrf.mxu0 }
 0x27f   : > { %1085 = vpow2.f32 %v802_v43  ;;  %v808_v47 = vmul.f32 1.442695, %v785_v44  ;;  %v783_v48 = vsub.f32 0.0, %v735_v45  ;;  %v756_v49 = vadd.f32 %v1053_v46, %v1251_v16 }
 0x280   : > { %v747_v50 = vpop.f32.mrf.mxu0 }
 0x281   : > { %1087 = vpow2.f32 %v808_v47  ;;  %v804_v51 = vmul.f32 1.442695, %v783_v48  ;;  %v788_v52 = vsub.f32 0.0, %v756_v49  ;;  %v748_v53 = vadd.f32 %v1251_v16, %v747_v50 }
 0x282   : > { %v1076_v54 = vpop.eup %1075  ;;  %v1054_v55 = vpop.f32.mrf.mxu0 }
 0x283   : > { %v828_v56 = vadd.f32 1.0, %v1076_v54  ;;  %1089 = vpow2.f32 %v804_v51  ;;  %v814_v57 = vmul.f32 1.442695, %v788_v52  ;;  %v786_v58 = vsub.f32 0.0, %v748_v53 }
 0x284   : > { %v1078_v59 = vpop.eup %1077  ;;  %v759_v60 = vadd.f32 %v1054_v55, %v1251_v16  ;;  %v750_v61 = vpop.f32.mrf.mxu0 }
 0x285   : > { %1091 = vrcp.f32 %v828_v56  ;;  %v826_v62 = vadd.f32 1.0, %v1078_v59  ;;  %v810_v63 = vmul.f32 1.442695, %v786_v58  ;;  %v751_v0 = vadd.f32 %v1251_v16, %v750_v61 }
 0x286   : > { %v1080_v1 = vpop.eup %1079  ;;  %1093 = vpow2.f32 %v814_v57  ;;  %v789_v2 = vsub.f32 0.0, %v759_v60  ;;  %v1057_v3 = vpop.f32.mrf.mxu0 }
 0x287   : > { %1095 = vrcp.f32 %v826_v62  ;;  %v829_v4 = vadd.f32 1.0, %v1080_v1  ;;  %v787_v5 = vsub.f32 0.0, %v751_v0  ;;  %v772_v6 = vadd.f32 %v1057_v3, %v1251_v16 }
 0x288   : > { %v1082_v7 = vpop.eup %1081  ;;  %1097 = vpow2.f32 %v810_v63  ;;  %v816_v8 = vmul.f32 1.442695, %v789_v2  ;;  %v763_v9 = vpop.f32.mrf.mxu0 }
 0x289   : > { %1099 = vrcp.f32 %v829_v4  ;;  %v827_v10 = vadd.f32 1.0, %v1082_v7  ;;  %v812_v11 = vmul.f32 1.442695, %v787_v5  ;;  %v792_v12 = vsub.f32 0.0, %v772_v6 }
 0x28a   : > { %v1084_v13 = vpop.eup %1083  ;;  %1101 = vpow2.f32 %v816_v8  ;;  %v764_v14 = vadd.f32 %v1251_v16, %v763_v9  ;;  %v1058_v15 = vpop.f32.mrf.mxu0 }
 0x28b   : > { %1103 = vrcp.f32 %v827_v10  ;;  %v832_v17 = vadd.f32 1.0, %v1084_v13  ;;  %v822_v18 = vmul.f32 1.442695, %v792_v12  ;;  %v775_v19 = vadd.f32 %v1058_v15, %v1251_v16 }
 0x28c   : > { %v1086_v20 = vpop.eup %1085  ;;  %1105 = vpow2.f32 %v812_v11  ;;  %v790_v21 = vsub.f32 0.0, %v764_v14  ;;  %v766_v22 = vpop.f32.mrf.mxu0 }
 0x28d   : > { %1107 = vrcp.f32 %v832_v17  ;;  %v830_v23 = vadd.f32 1.0, %v1086_v20  ;;  %v793_v24 = vsub.f32 0.0, %v775_v19  ;;  %v767_v25 = vadd.f32 %v1251_v16, %v766_v22 }
 0x28e   : > { %v1088_v26 = vpop.eup %1087  ;;  %1109 = vpow2.f32 %v822_v18  ;;  %v818_v27 = vmul.f32 1.442695, %v790_v21 }
 0x28f   : > { %1111 = vrcp.f32 %v830_v23  ;;  %v833_v28 = vadd.f32 1.0, %v1088_v26  ;;  %v824_v29 = vmul.f32 1.442695, %v793_v24  ;;  %v791_v30 = vsub.f32 0.0, %v767_v25 }
 0x290   : > { %v1090_v31 = vpop.eup %1089  ;;  %1113 = vpow2.f32 %v818_v27 }
 0x291   : > { %1115 = vrcp.f32 %v833_v28  ;;  %v831_v32 = vadd.f32 1.0, %v1090_v31  ;;  %v820_v16 = vmul.f32 1.442695, %v791_v30 }
 0x292   : > { %v1092_v33 = vpop.eup %1091  ;;  %1117 = vpow2.f32 %v824_v29 }
 0x293   : > { %v1094_v34 = vpop.eup %1093  ;;  %860 = vst.msk [vmem:[%s1274_s27 + $0x10] sm:$0xff] %vm315_vm1, %v1092_v33  ;;  %1119 = vrcp.f32 %v831_v32 }
 0x294   : > { %v1096_v35 = vpop.eup %1095  ;;  %v836_v36 = vadd.f32 1.0, %v1094_v34  ;;  %1121 = vpow2.f32 %v820_v16 }
 0x295   : > { %v1098_v37 = vpop.eup %1097  ;;  %858 = vst.msk [vmem:[%s1274_s27] sm:$0xff] %vm315_vm1, %v1096_v35 }
 0x296   : > { %v1100_v38 = vpop.eup %1099  ;;  %1123 = vrcp.f32 %v836_v36  ;;  %v834_v39 = vadd.f32 1.0, %v1098_v37 }
 0x297   : > { %v1102_v40 = vpop.eup %1101  ;;  %861 = vst.msk [vmem:[%s1274_s27 + $0x18] sm:$0xff] %vm315_vm1, %v1100_v38 }
 0x298   : > { %v1104_v41 = vpop.eup %1103  ;;  %1125 = vrcp.f32 %v834_v39  ;;  %v837_v42 = vadd.f32 1.0, %v1102_v40 }
 0x299   : > { %v1106_v43 = vpop.eup %1105  ;;  %859 = vst.msk [vmem:[%s1274_s27 + $0x8] sm:$0xff] %vm315_vm1, %v1104_v41 }
 0x29a   : > { %v1108_v44 = vpop.eup %1107  ;;  %1127 = vrcp.f32 %v837_v42  ;;  %v835_v45 = vadd.f32 1.0, %v1106_v43 }
 0x29b   : > { %v1110_v46 = vpop.eup %1109  ;;  %864 = vst.msk [vmem:[%s1274_s27 + $0x30] sm:$0xff] %vm315_vm1, %v1108_v44 }
 0x29c   : > { %v1112_v47 = vpop.eup %1111  ;;  %1129 = vrcp.f32 %v835_v45  ;;  %v840_v48 = vadd.f32 1.0, %v1110_v46 }
 0x29d   : > { %v1114_v49 = vpop.eup %1113  ;;  %862 = vst.msk [vmem:[%s1274_s27 + $0x20] sm:$0xff] %vm315_vm1, %v1112_v47 }
 0x29e   : > { %v1116_v50 = vpop.eup %1115  ;;  %1131 = vrcp.f32 %v840_v48  ;;  %v838_v51 = vadd.f32 1.0, %v1114_v49 }
 0x29f   : > { %v1118_v52 = vpop.eup %1117  ;;  %865 = vst.msk [vmem:[%s1274_s27 + $0x38] sm:$0xff] %vm315_vm1, %v1116_v50 }
 0x2a0   : > { %v1120_v53 = vpop.eup %1119  ;;  %1133 = vrcp.f32 %v838_v51  ;;  %v841_v54 = vadd.f32 1.0, %v1118_v52 }
 0x2a1   : > { %v1122_v55 = vpop.eup %1121  ;;  %863 = vst.msk [vmem:[%s1274_s27 + $0x28] sm:$0xff] %vm315_vm1, %v1120_v53 }
 0x2a2   : > { %1135 = vrcp.f32 %v841_v54  ;;  %v839_v56 = vadd.f32 1.0, %v1122_v55 }
 0x2a3   : > { %v1124_v57 = vpop.eup %1123 }
 0x2a4   : > { %868 = vst.msk [vmem:[%s1274_s27 + $0x50] sm:$0xff] %vm315_vm1, %v1124_v57  ;;  %1137 = vrcp.f32 %v839_v56 }
 0x2a5   : > { %v1126_v58 = vpop.eup %1125 }
 0x2a6   : > { %866 = vst.msk [vmem:[%s1274_s27 + $0x40] sm:$0xff] %vm315_vm1, %v1126_v58 }
 0x2a7   : > { %v1128_v59 = vpop.eup %1127 }
 0x2a8   : > { %869 = vst.msk [vmem:[%s1274_s27 + $0x58] sm:$0xff] %vm315_vm1, %v1128_v59 }
 0x2a9   : > { %v1130_v60 = vpop.eup %1129 }
 0x2aa   : > { %867 = vst.msk [vmem:[%s1274_s27 + $0x48] sm:$0xff] %vm315_vm1, %v1130_v60 }
 0x2ab   : > { %v1132_v61 = vpop.eup %1131 }
 0x2ac   : > { %872 = vst.msk [vmem:[%s1274_s27 + $0x70] sm:$0xff] %vm315_vm1, %v1132_v61 }
 0x2ad   : > { %v1134_v62 = vpop.eup %1133 }
 0x2ae   : > { %870 = vst.msk [vmem:[%s1274_s27 + $0x60] sm:$0xff] %vm315_vm1, %v1134_v62 }
 0x2af   : > { %v1136_v63 = vpop.eup %1135 }
 0x2b0   : > { %873 = vst.msk [vmem:[%s1274_s27 + $0x78] sm:$0xff] %vm315_vm1, %v1136_v63 }
 0x2b1   : > { %v1138_v0 = vpop.eup %1137 }
 0x2b2   : > { %871 = vst.msk [vmem:[%s1274_s27 + $0x68] sm:$0xff] %vm315_vm1, %v1138_v0 }
 0x2b3 PF: > { %s17_s24 = sadd.s32 1, %s1145_s24  }
 0x2b4   : > { %p14_p4 = scmp.ge.s32.totalorder %s17_s24, 4  }
 0x2b6   :  { %16 = sbr.rel (!%p14_p4) target bundleno = 1 (0x1), region = 78 }

</bundles_post_ra>
